<compile_context>
chip_gen: v6e
topology: v6e:2x2x1
jax: 0.10.0
libtpu: 0.0.40
codegen_flags: <defaults>
</compile_context>

<pallas_src>
import functools

import jax
import jax.numpy as jnp
from jax import lax
from jax.experimental import pallas as pl
from jax.experimental.pallas import tpu as pltpu


def _attn_kernel(x1_ref, x2_ref,
                 w_align_ref, wvoq_t_ref, wk_t_ref, k_bias_ref,
                 bo_ref, ln_w_ref, ln_b_ref,
                 o_ref,
                 *, num_heads, head_dim, block_b, seq_len1, seq_len2, dim_out):
    f32 = jnp.float32
    bf16 = jnp.bfloat16
    rows = block_b * seq_len1
    vo_width = num_heads * dim_out                       # 128 lanes at the test config

    x1 = x1_ref[...]                                     # (BB, S1, D1) bf16
    x2 = x2_ref[...]                                     # (BB, S2, D2) bf16

    # ---- Fused Vfold / Q projection over flattened BB*S1 rows. ----
    # Operand layout is [Wvo (H*dim_out) | Wq*inv_scale (dim_out)], so both
    # slices below start at lane offsets that are multiples of 128.
    x1_flat = x1.reshape(rows, x1.shape[-1])
    vq = jnp.dot(x1_flat, wvoq_t_ref[...],
                 preferred_element_type=f32)             # (R, H*dim_out + dim_out) f32
    vfold = vq[:, :vo_width].astype(bf16).reshape(block_b, seq_len1, vo_width)
    q3 = vq[:, vo_width:].astype(bf16).reshape(block_b, seq_len1, dim_out)

    # ---- K path: project x2 first (one flattened matmul), then apply the
    #      align_seq contraction along S2, then add the folded bias
    #      (b_align * rowsum(Wk)). ----
    x2_flat = x2.reshape(block_b * seq_len2, x2.shape[-1])
    kp = jnp.dot(x2_flat, wk_t_ref[...],
                 preferred_element_type=f32)             # (BB*S2, dim_out) f32
    kp3 = kp.astype(bf16).reshape(block_b, seq_len2, dim_out)
    w_align_b = jnp.broadcast_to(w_align_ref[...], (block_b, seq_len1, seq_len2))
    k3 = jnp.einsum("bts,bsn->btn", w_align_b, kp3,
                    preferred_element_type=f32)          # (BB, S1, dim_out) f32
    k3 = (k3 + k_bias_ref[...]).astype(bf16)

    # ---- Multi-head attention.  fc_out is pre-folded into vfold, so each
    #      head's P@V emits (BB, S1, dim_out) and the head sum is a plain
    #      accumulate; the 1/sqrt(head_dim) scale is folded into Wq. ----
    acc = jnp.zeros((block_b, seq_len1, dim_out), f32)
    for h in range(num_heads):
        qh = q3[:, :, h * head_dim:(h + 1) * head_dim]               # (BB, S1, hd)
        kh = k3[:, :, h * head_dim:(h + 1) * head_dim]
        s = jnp.einsum("bqe,bke->bqk", qh, kh,
                       preferred_element_type=f32)                   # (BB, S1, S1) f32
        s = s - jnp.max(s, axis=-1, keepdims=True)
        p = jnp.exp(s)
        p = p * pl.reciprocal(jnp.sum(p, axis=-1, keepdims=True), approx=True)
        vfh = vfold[:, :, h * dim_out:(h + 1) * dim_out]             # (BB, S1, dim_out)
        acc = acc + jnp.einsum("bqk,bke->bqe", p.astype(bf16), vfh,
                               preferred_element_type=f32)

    out = acc + bo_ref[...]                                          # fc_out bias

    # ---- LayerNorm (eps = 1e-5), fused single-pass statistics. ----
    inv_n = 1.0 / float(dim_out)
    s1 = jnp.sum(out, axis=-1, keepdims=True)
    s2 = jnp.sum(out * out, axis=-1, keepdims=True)
    mean = s1 * inv_n
    var = s2 * inv_n - mean * mean
    out = (out - mean) * lax.rsqrt(var + 1e-5)
    out = out * ln_w_ref[...] + ln_b_ref[...]

    # Dropout is identity in eval mode.
    o_ref[...] = out.astype(o_ref.dtype)


def bilinear_mhsa_forward(x1, x2, params, *, num_heads, block_b=None):
    B, S1, D1 = x1.shape
    _, S2, D2 = x2.shape
    dim_out = params["wq"].shape[0]
    assert dim_out % num_heads == 0
    head_dim = dim_out // num_heads
    bf16 = jnp.bfloat16
    f32 = jnp.float32

    # ---- Grid blocking: target ~256 rows/step (v6e/v7x MXU row dim; two row
    #      passes on v5e), but keep >= 2 grid steps when B allows so both v7x
    #      TensorCores get work and the pipeline has something to overlap.
    #      Per-step VMEM stays in the tens of KiB at these shapes; at production
    #      sizes (dim_out >~ 1-2K, S1 >~ 256) re-derive block_b and set
    #      vmem_limit_bytes explicitly (v7x has only 64 MiB VMEM).
    if block_b is None:
        target_rows = 256
        block_b = max(1, (target_rows + S1 - 1) // S1)
        if B >= 2:
            block_b = min(block_b, (B + 1) // 2)
    block_b = max(1, min(block_b, B))
    b_pad = ((B + block_b - 1) // block_b) * block_b

    # Inputs: module does .float() first; feed the MXU bf16 operands.
    x1f = x1.astype(f32).astype(bf16)
    x2f = x2.astype(f32).astype(bf16)
    if b_pad != B:
        x1f = jnp.pad(x1f, ((0, b_pad - B), (0, 0), (0, 0)))
        x2f = jnp.pad(x2f, ((0, b_pad - B), (0, 0), (0, 0)))

    # ---- Weight prep (outside the kernel, constant-folded under jit). ----
    inv_scale = 1.0 / (float(head_dim) ** 0.5)
    wq_t = params["wq"].T * inv_scale                       # (D1, dim_out), scale folded
    wo_t = params["wo"].T                                   # (dim_out, dim_out)
    wv_h = params["wv"].reshape(num_heads, head_dim, D1)    # (H, hd, D1)
    wo_h = wo_t.reshape(num_heads, head_dim, dim_out)       # (H, hd, dim_out)
    wvo = jnp.einsum("hed,hen->hdn", wv_h, wo_h)            # (H, D1, dim_out)
    wvo_flat = wvo.transpose(1, 0, 2).reshape(D1, num_heads * dim_out)
    # Layout [Vfold | Q]: both kernel-side slices start at 128-aligned lanes.
    wvoq_t = jnp.concatenate([wvo_flat, wq_t], axis=1).astype(bf16)   # (D1, H*N + N)
    wk_t = params["wk"].T.astype(bf16)                                # (D2, dim_out)
    w_align = params["w_align"].astype(bf16)                          # (S1, S2)
    # align bias folded through the K projection: b_align * rowsum(Wk).
    k_bias = (params["b_align"] *
              jnp.sum(params["wk"], axis=1)[None, :]).astype(f32)     # (S1, dim_out)
    bo = params["bo"].astype(f32)                                     # (1, dim_out)
    ln_w = params["ln_w"].astype(f32)
    ln_b = params["ln_b"].astype(f32)

    kernel = functools.partial(
        _attn_kernel, num_heads=num_heads, head_dim=head_dim,
        block_b=block_b, seq_len1=S1, seq_len2=S2, dim_out=dim_out)

    def full_spec(shape):
        return pl.BlockSpec(shape, lambda b: (0,) * len(shape))

    out = pl.pallas_call(
        kernel,
        out_shape=jax.ShapeDtypeStruct((b_pad, S1, dim_out), jnp.float32),
        grid_spec=pltpu.PrefetchScalarGridSpec(
            num_scalar_prefetch=0,
            grid=(b_pad // block_b,),
            in_specs=[
                pl.BlockSpec((block_b, S1, D1), lambda b: (b, 0, 0)),   # x1
                pl.BlockSpec((block_b, S2, D2), lambda b: (b, 0, 0)),   # x2
                full_spec(w_align.shape),
                full_spec(wvoq_t.shape),
                full_spec(wk_t.shape),
                full_spec(k_bias.shape),
                full_spec(bo.shape),
                full_spec(ln_w.shape),
                full_spec(ln_b.shape),
            ],
            out_specs=pl.BlockSpec((block_b, S1, dim_out), lambda b: (b, 0, 0)),
        ),
        compiler_params=pltpu.CompilerParams(dimension_semantics=("parallel",)),
    )(x1f, x2f, w_align, wvoq_t, wk_t, k_bias, bo, ln_w, ln_b)

    return out[:B]


def _reference_forward(x1, x2, params, *, num_heads):
    """Pure-JAX f32 reference mirroring the PyTorch module (eval mode)."""
    x1 = x1.astype(jnp.float32)
    x2 = x2.astype(jnp.float32)
    B, S1, _ = x1.shape
    dim_out = params["wq"].shape[0]
    head_dim = dim_out // num_heads

    x2a = jnp.einsum("bsd,ts->btd", x2, params["w_align"]) + params["b_align"].reshape(1, S1, 1)
    q = x1 @ params["wq"].T
    k = x2a @ params["wk"].T
    v = x1 @ params["wv"].T
    q = q.reshape(B, S1, num_heads, head_dim).transpose(0, 2, 1, 3)
    k = k.reshape(B, S1, num_heads, head_dim).transpose(0, 2, 1, 3)
    v = v.reshape(B, S1, num_heads, head_dim).transpose(0, 2, 1, 3)
    s = jnp.einsum("bhqd,bhkd->bhqk", q, k) / (head_dim ** 0.5)
    p = jax.nn.softmax(s, axis=-1)
    o = jnp.einsum("bhqk,bhkd->bhqd", p, v).transpose(0, 2, 1, 3).reshape(B, S1, dim_out)
    o = o @ params["wo"].T + params["bo"].reshape(1, 1, dim_out)
    mean = jnp.mean(o, axis=-1, keepdims=True)
    var = jnp.mean((o - mean) ** 2, axis=-1, keepdims=True)
    o = (o - mean) / jnp.sqrt(var + 1e-5)
    o = o * params["ln_w"].reshape(1, 1, dim_out) + params["ln_b"].reshape(1, 1, dim_out)
    return o


def init_params(key, *, dim_in1, dim_in2, dim_out, seq_len1, seq_len2):
    """Deterministic parameter init (uniform(-1/sqrt(fan_in), 1/sqrt(fan_in)))."""
    ks = jax.random.split(key, 8)

    def lin(k, out_f, in_f):
        bound = 1.0 / (in_f ** 0.5)
        return jax.random.uniform(k, (out_f, in_f), jnp.float32, -bound, bound)

    w_align = lin(ks[0], seq_len1, seq_len2)
    b_align = jax.random.uniform(ks[1], (seq_len1, 1), jnp.float32,
                                 -1.0 / (seq_len2 ** 0.5), 1.0 / (seq_len2 ** 0.5))
    wq = lin(ks[2], dim_out, dim_in1)
    wk = lin(ks[3], dim_out, dim_in2)
    wv = lin(ks[4], dim_out, dim_in1)
    wo = lin(ks[5], dim_out, dim_out)
    bo = jax.random.uniform(ks[6], (1, dim_out), jnp.float32,
                            -1.0 / (dim_out ** 0.5), 1.0 / (dim_out ** 0.5))
    ln_w = jnp.ones((1, dim_out), jnp.float32)
    ln_b = jnp.zeros((1, dim_out), jnp.float32)
    return dict(w_align=w_align, b_align=b_align, wq=wq, wk=wk, wv=wv,
                wo=wo, bo=bo, ln_w=ln_w, ln_b=ln_b)


if __name__ == "__main__":
    B, S1, S2 = 2, 8, 7
    DIM_IN1, DIM_IN2, DIM_OUT, NUM_HEADS = 16, 12, 32, 4

    root = jax.random.PRNGKey(0)
    k_x1, k_x2, k_p = jax.random.split(root, 3)
    x1 = jax.random.normal(k_x1, (B, S1, DIM_IN1), jnp.float32)
    x2 = jax.random.normal(k_x2, (B, S2, DIM_IN2), jnp.float32)
    params = init_params(k_p, dim_in1=DIM_IN1, dim_in2=DIM_IN2, dim_out=DIM_OUT,
                         seq_len1=S1, seq_len2=S2)

    out = jax.block_until_ready(bilinear_mhsa_forward(x1, x2, params, num_heads=NUM_HEADS))
    ref = _reference_forward(x1, x2, params, num_heads=NUM_HEADS)
    assert out.shape == (B, S1, DIM_OUT)
    err = float(jnp.max(jnp.abs(out - ref)))
    assert jnp.allclose(out, ref, atol=5e-2, rtol=5e-2), f"max abs err = {err}"

    # Second check: larger batch exercising batch-blocking, batch padding and a
    # multi-step "parallel" grid (block_b clamped so the grid has >= 2 steps).
    B2 = 20
    kx1b, kx2b = jax.random.split(jax.random.PRNGKey(1), 2)
    x1b = jax.random.normal(kx1b, (B2, S1, DIM_IN1), jnp.float32)
    x2b = jax.random.normal(kx2b, (B2, S2, DIM_IN2), jnp.float32)
    out_b = jax.block_until_ready(bilinear_mhsa_forward(x1b, x2b, params, num_heads=NUM_HEADS))
    ref_b = _reference_forward(x1b, x2b, params, num_heads=NUM_HEADS)
    err_b = float(jnp.max(jnp.abs(out_b - ref_b)))
    assert out_b.shape == (B2, S1, DIM_OUT)
    assert jnp.allclose(out_b, ref_b, atol=5e-2, rtol=5e-2), f"max abs err = {err_b}"

    print("KERNEL_OK")
</pallas_src>

<mosaic_0001>
module attributes {stable_mosaic.version = 11 : i64} {
  func.func @_attn_kernel(%arg0: i32, %arg1: memref<1x8x16xbf16, #tpu.memory_space<vmem>>, %arg2: memref<1x7x12xbf16, #tpu.memory_space<vmem>>, %arg3: memref<8x7xbf16, #tpu.memory_space<vmem>>, %arg4: memref<16x160xbf16, #tpu.memory_space<vmem>>, %arg5: memref<12x32xbf16, #tpu.memory_space<vmem>>, %arg6: memref<8x32xf32, #tpu.memory_space<vmem>>, %arg7: memref<1x32xf32, #tpu.memory_space<vmem>>, %arg8: memref<1x32xf32, #tpu.memory_space<vmem>>, %arg9: memref<1x32xf32, #tpu.memory_space<vmem>>, %arg10: memref<1x8x32xf32, #tpu.memory_space<vmem>>) attributes {dimension_semantics = [#tpu.dimension_semantics<parallel>], iteration_bounds = array<i64: 2>, scalar_prefetch = 0 : i64, scratch_operands = 0 : i64, tpu.core_type = #tpu.core_type<tc>, window_params = [{transform_indices = @transform_0, window_bounds = array<i64: 1, 8, 16>}, {transform_indices = @transform_1, window_bounds = array<i64: 1, 7, 12>}, {pipeline_mode = #tpu.pipeline_mode<synchronous>, transform_indices = @transform_2, window_bounds = array<i64: 8, 7>}, {pipeline_mode = #tpu.pipeline_mode<synchronous>, transform_indices = @transform_3, window_bounds = array<i64: 16, 160>}, {pipeline_mode = #tpu.pipeline_mode<synchronous>, transform_indices = @transform_4, window_bounds = array<i64: 12, 32>}, {pipeline_mode = #tpu.pipeline_mode<synchronous>, transform_indices = @transform_5, window_bounds = array<i64: 8, 32>}, {pipeline_mode = #tpu.pipeline_mode<synchronous>, transform_indices = @transform_6, window_bounds = array<i64: 1, 32>}, {pipeline_mode = #tpu.pipeline_mode<synchronous>, transform_indices = @transform_7, window_bounds = array<i64: 1, 32>}, {pipeline_mode = #tpu.pipeline_mode<synchronous>, transform_indices = @transform_8, window_bounds = array<i64: 1, 32>}, {transform_indices = @transform_9, window_bounds = array<i64: 1, 8, 32>}]} {
    %c0 = arith.constant 0 : index
    %c0_0 = arith.constant 0 : index
    %c0_1 = arith.constant 0 : index
    %0 = vector.load %arg1[%c0, %c0_0, %c0_1] : memref<1x8x16xbf16, #tpu.memory_space<vmem>>, vector<1x8x16xbf16>
    %c0_2 = arith.constant 0 : index
    %c0_3 = arith.constant 0 : index
    %c0_4 = arith.constant 0 : index
    %1 = vector.load %arg2[%c0_2, %c0_3, %c0_4] : memref<1x7x12xbf16, #tpu.memory_space<vmem>>, vector<1x7x12xbf16>
    %2 = vector.shape_cast %0 : vector<1x8x16xbf16> to vector<8x16xbf16>
    %c0_5 = arith.constant 0 : index
    %c0_6 = arith.constant 0 : index
    %3 = vector.load %arg4[%c0_5, %c0_6] : memref<16x160xbf16, #tpu.memory_space<vmem>>, vector<16x160xbf16>
    %cst = arith.constant dense<0.000000e+00> : vector<8x160xf32>
    %4 = tpu.matmul %2, %3, %cst {dimension_numbers = #tpu.dot_dimension_numbers<[1], [0], [0], [1], [0, 0, 1, 1], [], []>} : vector<8x16xbf16>, vector<16x160xbf16>, vector<8x160xf32> -> vector<8x160xf32>
    %5 = vector.extract_strided_slice %4 {offsets = [0, 0], sizes = [8, 128], strides = [1, 1]} : vector<8x160xf32> to vector<8x128xf32>
    %6 = arith.truncf %5 : vector<8x128xf32> to vector<8x128xbf16>
    %7 = vector.shape_cast %6 : vector<8x128xbf16> to vector<1x8x128xbf16>
    %8 = vector.extract_strided_slice %4 {offsets = [0, 128], sizes = [8, 32], strides = [1, 1]} : vector<8x160xf32> to vector<8x32xf32>
    %9 = arith.truncf %8 : vector<8x32xf32> to vector<8x32xbf16>
    %10 = vector.shape_cast %9 : vector<8x32xbf16> to vector<1x8x32xbf16>
    %11 = vector.shape_cast %1 : vector<1x7x12xbf16> to vector<7x12xbf16>
    %c0_7 = arith.constant 0 : index
    %c0_8 = arith.constant 0 : index
    %12 = vector.load %arg5[%c0_7, %c0_8] : memref<12x32xbf16, #tpu.memory_space<vmem>>, vector<12x32xbf16>
    %cst_9 = arith.constant dense<0.000000e+00> : vector<7x32xf32>
    %13 = tpu.matmul %11, %12, %cst_9 {dimension_numbers = #tpu.dot_dimension_numbers<[1], [0], [0], [1], [0, 0, 1, 1], [], []>} : vector<7x12xbf16>, vector<12x32xbf16>, vector<7x32xf32> -> vector<7x32xf32>
    %14 = arith.truncf %13 : vector<7x32xf32> to vector<7x32xbf16>
    %15 = vector.shape_cast %14 : vector<7x32xbf16> to vector<1x7x32xbf16>
    %c0_10 = arith.constant 0 : index
    %c0_11 = arith.constant 0 : index
    %16 = vector.load %arg3[%c0_10, %c0_11] : memref<8x7xbf16, #tpu.memory_space<vmem>>, vector<8x7xbf16>
    %17 = vector.shape_cast %16 : vector<8x7xbf16> to vector<1x8x7xbf16>
    "tpu.trace_start"() <{level = 10 : i32, message = "bts,bsn->btn"}> : () -> ()
    %cst_12 = arith.constant dense<0.000000e+00> : vector<1x8x32xf32>
    %18 = tpu.matmul %17, %15, %cst_12 {dimension_numbers = #tpu.dot_dimension_numbers<[2], [1], [1], [2], [0, 0, 0, 1, 1, 2], [0], [0]>} : vector<1x8x7xbf16>, vector<1x7x32xbf16>, vector<1x8x32xf32> -> vector<1x8x32xf32>
    "tpu.trace_stop"() : () -> ()
    %c0_13 = arith.constant 0 : index
    %c0_14 = arith.constant 0 : index
    %19 = vector.load %arg6[%c0_13, %c0_14] : memref<8x32xf32, #tpu.memory_space<vmem>>, vector<8x32xf32>
    %20 = vector.shape_cast %19 : vector<8x32xf32> to vector<1x8x32xf32>
    %21 = arith.addf %18, %20 : vector<1x8x32xf32>
    %22 = arith.truncf %21 : vector<1x8x32xf32> to vector<1x8x32xbf16>
    %cst_15 = arith.constant 0.000000e+00 : f32
    %23 = vector.broadcast %cst_15 : f32 to vector<1x8x32xf32>
    %24 = vector.extract_strided_slice %10 {offsets = [0, 0, 0], sizes = [1, 8, 8], strides = [1, 1, 1]} : vector<1x8x32xbf16> to vector<1x8x8xbf16>
    %25 = vector.extract_strided_slice %22 {offsets = [0, 0, 0], sizes = [1, 8, 8], strides = [1, 1, 1]} : vector<1x8x32xbf16> to vector<1x8x8xbf16>
    "tpu.trace_start"() <{level = 10 : i32, message = "bqe,bke->bqk"}> : () -> ()
    %cst_16 = arith.constant dense<0.000000e+00> : vector<1x8x8xf32>
    %26 = tpu.matmul %24, %25, %cst_16 {dimension_numbers = #tpu.dot_dimension_numbers<[2], [2], [1], [1], [0, 0, 0, 1, 1, 1], [0], [0]>} : vector<1x8x8xbf16>, vector<1x8x8xbf16>, vector<1x8x8xf32> -> vector<1x8x8xf32>
    "tpu.trace_stop"() : () -> ()
    %cst_17 = arith.constant dense<0xFF800000> : vector<1x8xf32>
    %27 = vector.multi_reduction <maximumf>, %26, %cst_17 [2] : vector<1x8x8xf32> to vector<1x8xf32>
    %28 = vector.shape_cast %27 : vector<1x8xf32> to vector<1x8x1xf32>
    %29 = vector.broadcast %28 : vector<1x8x1xf32> to vector<1x8x8xf32>
    %30 = arith.subf %26, %29 : vector<1x8x8xf32>
    %31 = math.exp %30 : vector<1x8x8xf32>
    %cst_18 = arith.constant dense<0.000000e+00> : vector<1x8xf32>
    %32 = vector.multi_reduction <add>, %31, %cst_18 [2] : vector<1x8x8xf32> to vector<1x8xf32>
    %33 = vector.shape_cast %32 : vector<1x8xf32> to vector<1x8x1xf32>
    %34 = tpu.reciprocal %33 {approx = true} : vector<1x8x1xf32> -> vector<1x8x1xf32>
    %35 = vector.broadcast %34 : vector<1x8x1xf32> to vector<1x8x8xf32>
    %36 = arith.mulf %31, %35 : vector<1x8x8xf32>
    %37 = vector.extract_strided_slice %7 {offsets = [0, 0, 0], sizes = [1, 8, 32], strides = [1, 1, 1]} : vector<1x8x128xbf16> to vector<1x8x32xbf16>
    %38 = arith.truncf %36 : vector<1x8x8xf32> to vector<1x8x8xbf16>
    "tpu.trace_start"() <{level = 10 : i32, message = "bqk,bke->bqe"}> : () -> ()
    %cst_19 = arith.constant dense<0.000000e+00> : vector<1x8x32xf32>
    %39 = tpu.matmul %38, %37, %cst_19 {dimension_numbers = #tpu.dot_dimension_numbers<[2], [1], [1], [2], [0, 0, 0, 1, 1, 2], [0], [0]>} : vector<1x8x8xbf16>, vector<1x8x32xbf16>, vector<1x8x32xf32> -> vector<1x8x32xf32>
    "tpu.trace_stop"() : () -> ()
    %40 = arith.addf %23, %39 : vector<1x8x32xf32>
    %41 = vector.extract_strided_slice %10 {offsets = [0, 0, 8], sizes = [1, 8, 8], strides = [1, 1, 1]} : vector<1x8x32xbf16> to vector<1x8x8xbf16>
    %42 = vector.extract_strided_slice %22 {offsets = [0, 0, 8], sizes = [1, 8, 8], strides = [1, 1, 1]} : vector<1x8x32xbf16> to vector<1x8x8xbf16>
    "tpu.trace_start"() <{level = 10 : i32, message = "bqe,bke->bqk"}> : () -> ()
    %cst_20 = arith.constant dense<0.000000e+00> : vector<1x8x8xf32>
    %43 = tpu.matmul %41, %42, %cst_20 {dimension_numbers = #tpu.dot_dimension_numbers<[2], [2], [1], [1], [0, 0, 0, 1, 1, 1], [0], [0]>} : vector<1x8x8xbf16>, vector<1x8x8xbf16>, vector<1x8x8xf32> -> vector<1x8x8xf32>
    "tpu.trace_stop"() : () -> ()
    %cst_21 = arith.constant dense<0xFF800000> : vector<1x8xf32>
    %44 = vector.multi_reduction <maximumf>, %43, %cst_21 [2] : vector<1x8x8xf32> to vector<1x8xf32>
    %45 = vector.shape_cast %44 : vector<1x8xf32> to vector<1x8x1xf32>
    %46 = vector.broadcast %45 : vector<1x8x1xf32> to vector<1x8x8xf32>
    %47 = arith.subf %43, %46 : vector<1x8x8xf32>
    %48 = math.exp %47 : vector<1x8x8xf32>
    %cst_22 = arith.constant dense<0.000000e+00> : vector<1x8xf32>
    %49 = vector.multi_reduction <add>, %48, %cst_22 [2] : vector<1x8x8xf32> to vector<1x8xf32>
    %50 = vector.shape_cast %49 : vector<1x8xf32> to vector<1x8x1xf32>
    %51 = tpu.reciprocal %50 {approx = true} : vector<1x8x1xf32> -> vector<1x8x1xf32>
    %52 = vector.broadcast %51 : vector<1x8x1xf32> to vector<1x8x8xf32>
    %53 = arith.mulf %48, %52 : vector<1x8x8xf32>
    %54 = vector.extract_strided_slice %7 {offsets = [0, 0, 32], sizes = [1, 8, 32], strides = [1, 1, 1]} : vector<1x8x128xbf16> to vector<1x8x32xbf16>
    %55 = arith.truncf %53 : vector<1x8x8xf32> to vector<1x8x8xbf16>
    "tpu.trace_start"() <{level = 10 : i32, message = "bqk,bke->bqe"}> : () -> ()
    %cst_23 = arith.constant dense<0.000000e+00> : vector<1x8x32xf32>
    %56 = tpu.matmul %55, %54, %cst_23 {dimension_numbers = #tpu.dot_dimension_numbers<[2], [1], [1], [2], [0, 0, 0, 1, 1, 2], [0], [0]>} : vector<1x8x8xbf16>, vector<1x8x32xbf16>, vector<1x8x32xf32> -> vector<1x8x32xf32>
    "tpu.trace_stop"() : () -> ()
    %57 = arith.addf %40, %56 : vector<1x8x32xf32>
    %58 = vector.extract_strided_slice %10 {offsets = [0, 0, 16], sizes = [1, 8, 8], strides = [1, 1, 1]} : vector<1x8x32xbf16> to vector<1x8x8xbf16>
    %59 = vector.extract_strided_slice %22 {offsets = [0, 0, 16], sizes = [1, 8, 8], strides = [1, 1, 1]} : vector<1x8x32xbf16> to vector<1x8x8xbf16>
    "tpu.trace_start"() <{level = 10 : i32, message = "bqe,bke->bqk"}> : () -> ()
    %cst_24 = arith.constant dense<0.000000e+00> : vector<1x8x8xf32>
    %60 = tpu.matmul %58, %59, %cst_24 {dimension_numbers = #tpu.dot_dimension_numbers<[2], [2], [1], [1], [0, 0, 0, 1, 1, 1], [0], [0]>} : vector<1x8x8xbf16>, vector<1x8x8xbf16>, vector<1x8x8xf32> -> vector<1x8x8xf32>
    "tpu.trace_stop"() : () -> ()
    %cst_25 = arith.constant dense<0xFF800000> : vector<1x8xf32>
    %61 = vector.multi_reduction <maximumf>, %60, %cst_25 [2] : vector<1x8x8xf32> to vector<1x8xf32>
    %62 = vector.shape_cast %61 : vector<1x8xf32> to vector<1x8x1xf32>
    %63 = vector.broadcast %62 : vector<1x8x1xf32> to vector<1x8x8xf32>
    %64 = arith.subf %60, %63 : vector<1x8x8xf32>
    %65 = math.exp %64 : vector<1x8x8xf32>
    %cst_26 = arith.constant dense<0.000000e+00> : vector<1x8xf32>
    %66 = vector.multi_reduction <add>, %65, %cst_26 [2] : vector<1x8x8xf32> to vector<1x8xf32>
    %67 = vector.shape_cast %66 : vector<1x8xf32> to vector<1x8x1xf32>
    %68 = tpu.reciprocal %67 {approx = true} : vector<1x8x1xf32> -> vector<1x8x1xf32>
    %69 = vector.broadcast %68 : vector<1x8x1xf32> to vector<1x8x8xf32>
    %70 = arith.mulf %65, %69 : vector<1x8x8xf32>
    %71 = vector.extract_strided_slice %7 {offsets = [0, 0, 64], sizes = [1, 8, 32], strides = [1, 1, 1]} : vector<1x8x128xbf16> to vector<1x8x32xbf16>
    %72 = arith.truncf %70 : vector<1x8x8xf32> to vector<1x8x8xbf16>
    "tpu.trace_start"() <{level = 10 : i32, message = "bqk,bke->bqe"}> : () -> ()
    %cst_27 = arith.constant dense<0.000000e+00> : vector<1x8x32xf32>
    %73 = tpu.matmul %72, %71, %cst_27 {dimension_numbers = #tpu.dot_dimension_numbers<[2], [1], [1], [2], [0, 0, 0, 1, 1, 2], [0], [0]>} : vector<1x8x8xbf16>, vector<1x8x32xbf16>, vector<1x8x32xf32> -> vector<1x8x32xf32>
    "tpu.trace_stop"() : () -> ()
    %74 = arith.addf %57, %73 : vector<1x8x32xf32>
    %75 = vector.extract_strided_slice %10 {offsets = [0, 0, 24], sizes = [1, 8, 8], strides = [1, 1, 1]} : vector<1x8x32xbf16> to vector<1x8x8xbf16>
    %76 = vector.extract_strided_slice %22 {offsets = [0, 0, 24], sizes = [1, 8, 8], strides = [1, 1, 1]} : vector<1x8x32xbf16> to vector<1x8x8xbf16>
    "tpu.trace_start"() <{level = 10 : i32, message = "bqe,bke->bqk"}> : () -> ()
    %cst_28 = arith.constant dense<0.000000e+00> : vector<1x8x8xf32>
    %77 = tpu.matmul %75, %76, %cst_28 {dimension_numbers = #tpu.dot_dimension_numbers<[2], [2], [1], [1], [0, 0, 0, 1, 1, 1], [0], [0]>} : vector<1x8x8xbf16>, vector<1x8x8xbf16>, vector<1x8x8xf32> -> vector<1x8x8xf32>
    "tpu.trace_stop"() : () -> ()
    %cst_29 = arith.constant dense<0xFF800000> : vector<1x8xf32>
    %78 = vector.multi_reduction <maximumf>, %77, %cst_29 [2] : vector<1x8x8xf32> to vector<1x8xf32>
    %79 = vector.shape_cast %78 : vector<1x8xf32> to vector<1x8x1xf32>
    %80 = vector.broadcast %79 : vector<1x8x1xf32> to vector<1x8x8xf32>
    %81 = arith.subf %77, %80 : vector<1x8x8xf32>
    %82 = math.exp %81 : vector<1x8x8xf32>
    %cst_30 = arith.constant dense<0.000000e+00> : vector<1x8xf32>
    %83 = vector.multi_reduction <add>, %82, %cst_30 [2] : vector<1x8x8xf32> to vector<1x8xf32>
    %84 = vector.shape_cast %83 : vector<1x8xf32> to vector<1x8x1xf32>
    %85 = tpu.reciprocal %84 {approx = true} : vector<1x8x1xf32> -> vector<1x8x1xf32>
    %86 = vector.broadcast %85 : vector<1x8x1xf32> to vector<1x8x8xf32>
    %87 = arith.mulf %82, %86 : vector<1x8x8xf32>
    %88 = vector.extract_strided_slice %7 {offsets = [0, 0, 96], sizes = [1, 8, 32], strides = [1, 1, 1]} : vector<1x8x128xbf16> to vector<1x8x32xbf16>
    %89 = arith.truncf %87 : vector<1x8x8xf32> to vector<1x8x8xbf16>
    "tpu.trace_start"() <{level = 10 : i32, message = "bqk,bke->bqe"}> : () -> ()
    %cst_31 = arith.constant dense<0.000000e+00> : vector<1x8x32xf32>
    %90 = tpu.matmul %89, %88, %cst_31 {dimension_numbers = #tpu.dot_dimension_numbers<[2], [1], [1], [2], [0, 0, 0, 1, 1, 2], [0], [0]>} : vector<1x8x8xbf16>, vector<1x8x32xbf16>, vector<1x8x32xf32> -> vector<1x8x32xf32>
    "tpu.trace_stop"() : () -> ()
    %91 = arith.addf %74, %90 : vector<1x8x32xf32>
    %c0_32 = arith.constant 0 : index
    %c0_33 = arith.constant 0 : index
    %92 = vector.load %arg7[%c0_32, %c0_33] : memref<1x32xf32, #tpu.memory_space<vmem>>, vector<1x32xf32>
    %93 = vector.shape_cast %92 : vector<1x32xf32> to vector<1x1x32xf32>
    %94 = vector.broadcast %93 : vector<1x1x32xf32> to vector<1x8x32xf32>
    %95 = arith.addf %91, %94 : vector<1x8x32xf32>
    %cst_34 = arith.constant dense<0.000000e+00> : vector<1x8xf32>
    %96 = vector.multi_reduction <add>, %95, %cst_34 [2] : vector<1x8x32xf32> to vector<1x8xf32>
    %97 = vector.shape_cast %96 : vector<1x8xf32> to vector<1x8x1xf32>
    %98 = arith.mulf %95, %95 : vector<1x8x32xf32>
    %cst_35 = arith.constant dense<0.000000e+00> : vector<1x8xf32>
    %99 = vector.multi_reduction <add>, %98, %cst_35 [2] : vector<1x8x32xf32> to vector<1x8xf32>
    %100 = vector.shape_cast %99 : vector<1x8xf32> to vector<1x8x1xf32>
    %cst_36 = arith.constant 3.125000e-02 : f32
    %101 = vector.broadcast %cst_36 : f32 to vector<1x8x1xf32>
    %102 = arith.mulf %97, %101 : vector<1x8x1xf32>
    %cst_37 = arith.constant 3.125000e-02 : f32
    %103 = vector.broadcast %cst_37 : f32 to vector<1x8x1xf32>
    %104 = arith.mulf %100, %103 : vector<1x8x1xf32>
    %105 = arith.mulf %102, %102 : vector<1x8x1xf32>
    %106 = arith.subf %104, %105 : vector<1x8x1xf32>
    %107 = vector.broadcast %102 : vector<1x8x1xf32> to vector<1x8x32xf32>
    %108 = arith.subf %95, %107 : vector<1x8x32xf32>
    %cst_38 = arith.constant 9.99999974E-6 : f32
    %109 = vector.broadcast %cst_38 : f32 to vector<1x8x1xf32>
    %110 = arith.addf %106, %109 : vector<1x8x1xf32>
    %111 = math.rsqrt %110 : vector<1x8x1xf32>
    %112 = vector.broadcast %111 : vector<1x8x1xf32> to vector<1x8x32xf32>
    %113 = arith.mulf %108, %112 : vector<1x8x32xf32>
    %c0_39 = arith.constant 0 : index
    %c0_40 = arith.constant 0 : index
    %114 = vector.load %arg8[%c0_39, %c0_40] : memref<1x32xf32, #tpu.memory_space<vmem>>, vector<1x32xf32>
    %115 = vector.shape_cast %114 : vector<1x32xf32> to vector<1x1x32xf32>
    %116 = vector.broadcast %115 : vector<1x1x32xf32> to vector<1x8x32xf32>
    %117 = arith.mulf %113, %116 : vector<1x8x32xf32>
    %c0_41 = arith.constant 0 : index
    %c0_42 = arith.constant 0 : index
    %118 = vector.load %arg9[%c0_41, %c0_42] : memref<1x32xf32, #tpu.memory_space<vmem>>, vector<1x32xf32>
    %119 = vector.shape_cast %118 : vector<1x32xf32> to vector<1x1x32xf32>
    %120 = vector.broadcast %119 : vector<1x1x32xf32> to vector<1x8x32xf32>
    %121 = arith.addf %117, %120 : vector<1x8x32xf32>
    %c0_43 = arith.constant 0 : index
    %c0_44 = arith.constant 0 : index
    %c0_45 = arith.constant 0 : index
    %122 = vector.load %arg10[%c0_43, %c0_44, %c0_45] : memref<1x8x32xf32, #tpu.memory_space<vmem>>, vector<1x8x32xf32>
    tpu.vector_store %arg10[%c0_43, %c0_44, %c0_45], %121 {strides = array<i32>} : memref<1x8x32xf32, #tpu.memory_space<vmem>>, vector<1x8x32xf32>,
    return
  }
  func.func @transform_0(%arg0: i32) -> (i32, i32, i32) {
    %c0_i32 = arith.constant 0 : i32
    %c0_i32_0 = arith.constant 0 : i32
    %c0_i32_1 = arith.constant 0 : i32
    return %arg0, %c0_i32, %c0_i32_0 : i32, i32, i32
  }
  func.func @transform_1(%arg0: i32) -> (i32, i32, i32) {
    %c0_i32 = arith.constant 0 : i32
    %c0_i32_0 = arith.constant 0 : i32
    %c0_i32_1 = arith.constant 0 : i32
    return %arg0, %c0_i32, %c0_i32_0 : i32, i32, i32
  }
  func.func @transform_2(%arg0: i32) -> (i32, i32) {
    %c0_i32 = arith.constant 0 : i32
    %c0_i32_0 = arith.constant 0 : i32
    %c0_i32_1 = arith.constant 0 : i32
    return %c0_i32, %c0_i32_0 : i32, i32
  }
  func.func @transform_3(%arg0: i32) -> (i32, i32) {
    %c0_i32 = arith.constant 0 : i32
    %c0_i32_0 = arith.constant 0 : i32
    %c0_i32_1 = arith.constant 0 : i32
    return %c0_i32, %c0_i32_0 : i32, i32
  }
  func.func @transform_4(%arg0: i32) -> (i32, i32) {
    %c0_i32 = arith.constant 0 : i32
    %c0_i32_0 = arith.constant 0 : i32
    %c0_i32_1 = arith.constant 0 : i32
    return %c0_i32, %c0_i32_0 : i32, i32
  }
  func.func @transform_5(%arg0: i32) -> (i32, i32) {
    %c0_i32 = arith.constant 0 : i32
    %c0_i32_0 = arith.constant 0 : i32
    %c0_i32_1 = arith.constant 0 : i32
    return %c0_i32, %c0_i32_0 : i32, i32
  }
  func.func @transform_6(%arg0: i32) -> (i32, i32) {
    %c0_i32 = arith.constant 0 : i32
    %c0_i32_0 = arith.constant 0 : i32
    %c0_i32_1 = arith.constant 0 : i32
    return %c0_i32, %c0_i32_0 : i32, i32
  }
  func.func @transform_7(%arg0: i32) -> (i32, i32) {
    %c0_i32 = arith.constant 0 : i32
    %c0_i32_0 = arith.constant 0 : i32
    %c0_i32_1 = arith.constant 0 : i32
    return %c0_i32, %c0_i32_0 : i32, i32
  }
  func.func @transform_8(%arg0: i32) -> (i32, i32) {
    %c0_i32 = arith.constant 0 : i32
    %c0_i32_0 = arith.constant 0 : i32
    %c0_i32_1 = arith.constant 0 : i32
    return %c0_i32, %c0_i32_0 : i32, i32
  }
  func.func @transform_9(%arg0: i32) -> (i32, i32, i32) {
    %c0_i32 = arith.constant 0 : i32
    %c0_i32_0 = arith.constant 0 : i32
    %c0_i32_1 = arith.constant 0 : i32
    return %arg0, %c0_i32, %c0_i32_0 : i32, i32, i32
  }
}

</mosaic_0001>

<bundles_post_ra>
// kernel: tpu_custom_call.1
= control target key start
LH: loop header
LB: loop body
LE: loop exit
PB: predicated region body
PF: predicated region fallthrough
CT: control target
= control target key end

     0   :  { %s1849_s0 = inlined_call_operand.hbm [shape: bf16[2,8,16], index: 0, kind: input, shape index: {}]   ;;  %s1850_s1 = inlined_call_operand.vmem [shape: bf16[2,7,12], index: 1, kind: input, shape index: {}]   ;;  %s1851_s2 = inlined_call_operand.hbm [shape: bf16[8,7], index: 2, kind: input, shape index: {}]   ;;  %s1852_s3 = inlined_call_operand.vmem [shape: bf16[16,160], index: 3, kind: input, shape index: {}]   ;;  %s1853_s4 = inlined_call_operand.hbm [shape: bf16[12,32], index: 4, kind: input, shape index: {}]   ;;  %s1854_s5 = inlined_call_operand.vmem [shape: f32[8,32], index: 5, kind: input, shape index: {}]   ;;  %s1855_s6 = inlined_call_operand.vmem [shape: f32[1,32], index: 6, kind: input, shape index: {}]   ;;  %s1856_s7 = inlined_call_operand.vmem [shape: f32[1,32], index: 7, kind: input, shape index: {}]   ;;  %s1857_s8 = inlined_call_operand.vmem [shape: f32[1,32], index: 8, kind: input, shape index: {}]   ;;  %s1858_s9 = inlined_call_operand.hbm [shape: f32[2,8,32], index: 9, kind: output, shape index: {}]  }
   0x1   :  { %1864 = sst [smem:[#allocation14_spill]] %s1851_s2 }
   0x2   :  { %1865 = sst [smem:[#allocation15_spill]] %s1853_s4 }
   0x3   :  { %14 = vsyncpa [#allocation3], 0 }
   0x4   :  { %16 = vsyncpa [#allocation3 + $0x1], 0 }
   0x5   :  { %17 = vsyncpa [#allocation6], 0 }
   0x6   :  { %18 = vsyncpa [#allocation4], 0 }
   0x7   :  { %20 = vsyncpa [#allocation4 + $0x1], 0  ;;  %s1591_s30 = smov 0   ;;  %s1593_s10 = smov 0  }
   0x8   :  { %s1595_s11 = smov 0   ;;  %s1597_s12 = smov 0  }
   0x9 LB: > { %1866 = sst [smem:[#allocation12_spill]] %s1519_s11  ;;  %s1612_s13 = sadd.s32 4294967295, %s1523_s12   ;;  %s1523_s12 = sphi %s1597_s12, %s1888_s12   ;;  %s1519_s11 = sphi %s1595_s11, %s1885_s11   ;;  %s1515_s10 = sphi %s1593_s10, %s1887_s10   ;;  %s1511_s30 = sphi %s1591_s30, %s1886_s30  }
   0xa   : > { %s1160_s14 = sadd.s32 4294967294, %s1523_s12   ;;  %p46_p0 = scmp.ne.s32.totalorder %s1515_s10, %s1511_s30 }
   0xb   : > { %p1859_p1 = scmp.eq.s32.totalorder %s1612_s13, 0  ;;  %p249_p3 = scmp.eq.s32.totalorder %s1160_s14, 1 }
   0xc   : > { %p1161_p5 = scmp.ge.s32.totalorder %s1523_s12, 1  ;;  %p256_p7 = scmp.lt.s32.totalorder %s1523_s12, 3 }
   0xd   : > { %p1621_p4 = por %p1859_p1, %p46_p0  ;;  %p1626_p6 = por %p249_p3, %p46_p0 }
   0xe   : > { %p1631_p8 = pnand %p1161_p5, %p256_p7  ;;  %s1525_s18 = smov [#allocation5]  }
   0xf   : > { %s1867_s15 = scalar_select %p1621_p4, 1, 0 }
  0x10   : > { %s1868_s16 = scalar_select %p1626_p6, 1, 0 }
  0x11   : > { %s1869_s17 = scalar_select %p1631_p8, 1, 0 }
  0x12   : > { %s269_s19 = sshll.u32 %s1525_s18, 4  ;;  %p1286_p10 = pneg %p1631_p8  ;;  %s270_s19 = int_to_ptr.vmem [resolvable:$true] %s269_s19 }
  0x13   : > { %s1526_s20 = smov [#allocation7]   ;;  %s1386_s23 = scalar_lea.vmem %s270_s19, 64 }
  0x14   : > { %s282_s21 = sshll.u32 %s1526_s20, 4  ;;  %p1640_p11 = pnand %p1286_p10, %p1859_p1  ;;  %s283_s21 = int_to_ptr.vmem [resolvable:$true] %s282_s21 }
  0x15   : > { %p1387_p13 = scmp.ne.s32.totalorder %s270_s19, %s1386_s23  ;;  %p1394_p5 = scmp.lt.s32.totalorder %s270_s19, %s270_s19 }
  0x16   : > { %p1377_p12 = pneg %p1640_p11  ;;  %p1395_p7 = scmp.lt.s32.totalorder %s1386_s23, %s1386_s23 }
  0x18   : > { %p1389_p0 = pnand %p1387_p13, %p1377_p12  ;;  %p1396_p9 = por %p1395_p7, %p1394_p5 }
  0x1a   : > { %p1390_p3 = pneg %p1389_p0 }
  0x1c   : > { %p1397_p2 = pnand %p1396_p9, %p1390_p3 }
  0x1e   : > { %1400 = shalt.err (!%p1397_p2)
}
  0x1f   : > { %s1871_s2 = sld [smem:[#allocation14_spill]]  ;;  %s1412_s26 = scalar_lea.vmem %s283_s21, 128 }
  0x20   : > { %p1413_p10 = scmp.ne.s32.totalorder %s283_s21, %s1412_s26  ;;  %p1420_p13 = scmp.lt.s32.totalorder %s283_s21, %s283_s21 }
  0x21   : > { %p1421_p0 = scmp.lt.s32.totalorder %s1412_s26, %s1412_s26 }
  0x22   : > { %p1415_p1 = pnand %p1413_p10, %p1377_p12 }
  0x23   : > { %p1422_p4 = por %p1421_p0, %p1420_p13 }
  0x24   : > { %p1416_p6 = pneg %p1415_p1 }
  0x25   : > { %1289 = dma.hbm_to_vmem [thread:$0]  (!%p1640_p11), %s1871_s2, 64, %s270_s19, [#allocation6]  }
  0x26   : > { %p1423_p8 = pnand %p1422_p4, %p1416_p6 }
  0x28   : > { %1426 = shalt.err (!%p1423_p8)
}
  0x29   : > { %s1527_s27 = smov 64   ;;  %s1528_s28 = smov 4  }
  0x2a   : > { %s1872_s4 = sld [smem:[#allocation15_spill]]  ;;  %s1663_s18 = sadd.s32 1, %s1523_s12  }
  0x2b   : > { %s33_s19 = sadd.s32 1, %s1519_s11  ;;  %s30_s20 = ssub.s32 %s1523_s12, %s1663_s18 }
  0x2c   : > { %p40_p1 = scmp.ne.s32.totalorder %s1519_s11, %s1515_s10  ;;  %p31_p2 = scmp.eq.s32.totalorder %s30_s20, 0 }
  0x2d   : > { %p41_p4 = scmp.eq.s32.totalorder %s1523_s12, 0  ;;  %p1873_p6 = scmp.eq.s32.totalorder %s1612_s13, 1 }
  0x2e   : > { %p1303_p9 = scmp.lt.s32.totalorder %s1523_s12, 2  ;;  %s308_s22 = sand.u32 1, %s1519_s11  }
  0x2f   : > { %p1673_p8 = por %p1873_p6, %p40_p1  ;;  %p42_p12 = por %p41_p4, %p40_p1 }
  0x30   : > { %1292 = dma.hbm_to_vmem [thread:$0]  (!%p1640_p11), %s1872_s4, 128, %s283_s21, [#allocation6], %s1527_s27, %s1527_s27, %s1528_s28  }
  0x31   : > { %s1874_s23 = scalar_select %p1673_p8, 1, 0 }
  0x32   : > { %s1679_s24 = scalar_select %p31_p2, %s1519_s11, %s33_s19  }
  0x33   : > { %s1165_s25 = sshll.u32 %s308_s22, 2  ;;  %s1166_s21 = sshll.u32 %s1523_s12, 6 }
  0x34   : > { %1875 = sst [smem:[#allocation13_spill]] %s1679_s24  ;;  %s1686_s28 = scalar_lea.hbm %s1849_s0, %s1166_s21 }
  0x35   : > { %s312_s29 = scalar_lea.vmem [#allocation2], %s1165_s25  ;;  %p1688_p11 = pnand %p1303_p9, %p42_p12 }
  0x36   : > { %s319_s14 = sshll.u32 %s312_s29, 4  ;;  %s309_s19 = scalar_lea.sflag [#allocation3], %s308_s22  ;;  %s320_s14 = int_to_ptr.vmem [resolvable:$true] %s319_s14 }
  0x37   : > { %s1427_s2 = scalar_lea.hbm %s1686_s28, 64  ;;  %p1429_p5 = pneg %p1688_p11 }
  0x38   : > { %p1428_p3 = scmp.ne.s32.totalorder %s1686_s28, %s1427_s2  ;;  %s1432_s27 = scalar_lea.hbm %s1849_s0, 128 }
  0x39   : > { %p1433_p13 = scmp.lt.s32.totalorder %s1686_s28, %s1849_s0  ;;  %p1434_p0 = scmp.lt.s32.totalorder %s1432_s27, %s1427_s2 }
  0x3a   : > { %p1430_p7 = pnand %p1429_p5, %p1428_p3 }
  0x3b   : > { %p1435_p1 = por %p1434_p0, %p1433_p13 }
  0x3c   : > { %p1431_p10 = pneg %p1430_p7 }
  0x3e   : > { %p1436_p2 = pnand %p1435_p1, %p1431_p10 }
  0x40   : > { %1439 = shalt.err (!%p1436_p2)
}
  0x41   : > { %s1440_s29 = scalar_lea.vmem %s320_s14, 64  ;;  %s1529_s22 = smov [#allocation2]  }
  0x42   : > { %p1441_p4 = scmp.ne.s32.totalorder %s320_s14, %s1440_s29  ;;  %s1445_s24 = sshll.u32 %s1529_s22, 4  ;;  %s1446_s24 = int_to_ptr.vmem [resolvable:$false] %s1445_s24 }
  0x43   : > { %s1447_s11 = scalar_lea.vmem %s1446_s24, 128  ;;  %p1448_p12 = scmp.lt.s32.totalorder %s320_s14, %s1446_s24 }
  0x44   : > { %p1443_p6 = pnand %p1441_p4, %p1429_p5  ;;  %p1449_p3 = scmp.lt.s32.totalorder %s1447_s11, %s1440_s29 }
  0x46   : > { %p1444_p9 = pneg %p1443_p6  ;;  %p1450_p7 = por %p1449_p3, %p1448_p12 }
  0x48   : > { %p1451_p8 = pnand %p1450_p7, %p1444_p9 }
  0x4a   : > { %1454 = shalt.err (!%p1451_p8)
}
  0x4b   : > { %1296 = dma.hbm_to_vmem [thread:$0]  (!%p1688_p11), %s1686_s28, 64, %s320_s14, %s309_s19  }
  0x4c   : > { %p1877_p10 = scmp.ne.s32.totalorder %s1869_s17, 0 }
  0x4d   : > { %s1709_s2 = sand.u32 (!%p1877_p10), 1, %s1515_s10   ;;  %p1878_p5 = scmp.ne.s32.totalorder (!%p1877_p10), %s1867_s15, 0 }
  0x4e   : > { %335 = sbr.rel (%p1877_p10) target bundleno = 2021 (0x7e5), region = 56  ;;  %s1168_s4 = sshll.u32 (!%p1877_p10), %s1709_s2, 2 }
  0x4f   : > { %s338_s21 = scalar_lea.sflag (!%p1877_p10), [#allocation3], %s1709_s2  ;;  %s341_s24 = scalar_lea.vmem (!%p1877_p10), [#allocation2], %s1168_s4 }
  0x53   : > { %1498 = dma.done.wait (%p1878_p5), %s338_s21, 64  }
  0x54   : > { %1500 = vsyncadd (%p1878_p5), %s338_s21, 4294967232  ;;  %p1879_p8 = scmp.eq.s32.totalorder %s1612_s13, 0 }
  0x56   : > { %1502 = dma.done.wait (%p1879_p8), [#allocation6], 192   ;;  %p1880_p11 = pmov %p1879_p8 }
  0x57   : > { %p388_p13 = scmp.lt.s32.totalorder %s1612_s13, 1  ;;  %v1530_v0 = vmov 0.0   ;;  %vm1531_vm0 = vmmov 0   ;;  %v1532_v1 = vmov 0   ;;  %vm465_vm1 = vcmask 1045504   ;;  %v511_v22 = vld [vmem:[%s1854_s5] sm:$0xff] }
  0x58   : > { %1504 = vsyncadd (%p1880_p11), [#allocation6], 4294967104  ;;  %1214 = vmatprep.subr.bf16.mxu1 %v1530_v0  ;;  %1216 = vmatprep.mubr.msk.bf16.mxu1 %vm1531_vm0, %v1530_v0  ;;  %v1353_v2 = vld [vmem:[#allocation7] sm:$0x3f]   ;;  %v1356_v5 = vld [vmem:[%s1852_s3] ss:$8 sps:$4 sm:$0xff]  }
  0x59   : > { %s389_s11 = scalar_select %p388_p13, %s1612_s13, 1  ;;  %443 = vmatprep.mubr.bf16.mxu0 %v1532_v1  ;;  %v467_v3 = vsel %vm465_vm1, %v1353_v2, 0  ;;  %v1354_v4 = vld [vmem:[%s1852_s3 + $0x4] ss:$8 sps:$4 sm:$0xff]   ;;  %vm461_vm2 = vcmask 97280   ;;  %vm407_vm3 = vcmask 130048  }
  0x5a   : > { %1215 = vmatpush3.bf16.msra.mxu1 %v467_v3  ;;  %425 = vmatprep.subr.bf16.mxu0 %v1354_v4  ;;  %v393_v7 = vld [vmem:[%s341_s24] sm:$0xf]  ;;  %vm516_vm4 = vcmask 1042432   ;;  %vm517_vm5 = vcmask 1043456   ;;  %v1533_v8 = vmov 65535   ;;  %vm512_vm6 = vcmask 56320  }
  0x5b   : > { %s1172_s15 = sshll.u32 %s389_s11, 2  ;;  %1226 = vmatprep.subr.bf16.mxu1 %v1530_v0  ;;  %426 = vmatpush1.bf16.msra.mxu0 %v1356_v5  ;;  %v518_v9 = vsel %vm516_vm4, 4294967295, %v1533_v8  ;;  %v510_v18 = vld [vmem:[#allocation5] sm:$0xf]  ;;  %vm564_vm7 = vcmask 64512   ;;  %s1534_s22 = smov 120  }
  0x5c   : > { %s391_s14 = scalar_lea.vmem %s1850_s1, %s1172_s15  ;;  %1220 = vmatprep.subr.bf16.mxu0 %v1530_v0  ;;  %v519_v11 = vsel %vm517_vm5, %v518_v9, 0  ;;  %s1535_s4 = smov 96   ;;  %vm1012_vm8 = vcmask 261120  }
  0x5d   : > { %v394_v6 = vld [vmem:[%s391_s14] sm:$0xf]  ;;  %s1536_s21 = smov 112   ;;  %s1537_s24 = smov 104  }
  0x5e   : > { %1217 = vmatmul.mubr.msk.bf16.vlgmr.msra.gmra.mxu1 %vm461_vm2, %v394_v6  ;;  %1175 = vmatmul.mubr.msk.bf16.vlgmr.msra.gmra.mxu0 %vm407_vm3, %v393_v7  ;;  %s1538_s11 = smov 64   ;;  %s1539_s15 = smov 32  }
  0x5f   : > { %1228 = vmatprep.mubr.msk.bf16.mxu1 %vm1531_vm0, %v1530_v0  ;;  %1222 = vmatprep.mubr.msk.bf16.mxu0 %vm1531_vm0, %v1530_v0  ;;  %s1171_s14 = sshll.u32 %s1709_s2, 3  ;;  %s1191_s25 = sshll.u32 %s1612_s13, 7 }
  0x60   : > { %s387_s29 = scalar_lea.vmem [#allocation8], %s1171_s14  ;;  %p1881_p1 = scmp.ne.s32.totalorder %s1874_s23, 0 }
  0x61   : > { %s1540_s17 = smov [#allocation8]  }
  0x62   : > { %s1459_s28 = sshll.u32 %s1540_s17, 4  ;;  %s1460_s28 = int_to_ptr.vmem [resolvable:$false] %s1459_s28 }
  0x63   : > { %s1461_s13 = scalar_lea.vmem %s1460_s28, 256 }
 0x11e   : > { %v503_v10 = vpop.f32.mrf.mxu1  ;;  %v445_v14 = vpop.f32.mrf.mxu0 }
 0x11f   : > { %v509_v12 = vpack.c.bf16 %v503_v10, %v503_v10  ;;  %v1750_v31 = vpack.c.bf16 %v445_v14, %v445_v14 }
 0x120   : > { %v1218_v13 = vpop.f32.mrf.mxu1  ;;  %v447_v17 = vpop.f32.mrf.mxu0 }
 0x121   : > { %v521_v15 = vand.u32 %v519_v11, %v509_v12  ;;  %v453_v30 = vpack.c.bf16 %v447_v17, %v447_v17  ;;  %v740_v37 = vsel %vm517_vm5, %v1750_v31, 0 }
 0x122   : > { %v506_v16 = vpop.f32.mrf.mxu1  ;;  %v449_v20 = vpop.f32.mrf.mxu0 }
 0x123   : > { %1221 = vmatpush3.bf16.msra.mxu0 %v521_v15 }
 0x124   : > { %v1219_v19 = vpop.f32.mrf.mxu1  ;;  %1232 = vmatprep.subr.bf16.mxu0 %v1530_v0  ;;  %v450_v21 = vpop.f32.mrf.mxu0 }
 0x126   : > { %1223 = vmatmul.mubr.msk.bf16.vlgmr.msra.gmra.mxu0 %vm512_vm6, %v510_v18 }
 0x127   : > { %1234 = vmatprep.mubr.msk.bf16.mxu0 %vm1531_vm0, %v1530_v0 }
 0x1e6   : > { %v557_v23 = vpop.f32.mrf.mxu0 }
 0x1e7   : > { %v558_v24 = vadd.f32 %v557_v23, %v511_v22 }
 0x1e8   : > { %v1224_v25 = vpop.f32.mrf.mxu0 }
 0x1e9   : > { %v563_v26 = vpack.c.bf16 %v558_v24, %v558_v24 }
 0x1ea   : > { %v560_v27 = vpop.f32.mrf.mxu0 }
 0x1eb   : > { %627 = vrot.lane.b32.xlu0 %v563_v26, %s1534_s22  ;;  %v569_v28 = vsel %vm564_vm7, %v563_v26, 0 }
 0x1ec   : > { %v1225_v29 = vpop.f32.mrf.mxu0  ;;  %1227 = vmatpush3.bf16.xpose.msra.mxu1 %v569_v28 }
 0x1ed   : > { %1238 = vmatprep.subr.bf16.mxu1 %v1530_v0 }
 0x1ef   : > { %624 = vrot.lane.b32.xlu0 %v453_v30, %s1534_s22  ;;  %s1059_s22 = sshll.u32 %s387_s29, 4  ;;  %s1060_s22 = int_to_ptr.vmem [resolvable:$true] %s1059_s22 }
 0x1f0   : > { %p1462_p6 = scmp.lt.s32.totalorder %s1060_s22, %s1460_s28 }
 0x1f3   : > { %688 = vrot.lane.b32.xlu0 %v1750_v31, %s1535_s4  ;;  %1229 = vmatmul.mubr.msk.bf16.vlgmr.msra.gmra.mxu1 %vm564_vm7, %v453_v30 }
 0x1f4   : > { %1240 = vmatprep.mubr.msk.bf16.mxu1 %vm1531_vm0, %v1530_v0 }
 0x1f7   : > { %782 = vrot.lane.b32.xlu0 %v453_v30, %s1536_s21 }
 0x1fb   : > { %895 = vrot.lane.b32.xlu0 %v563_v26, %s1537_s24 }
 0x1ff   : > { %893 = vrot.lane.b32.xlu0 %v453_v30, %s1537_s24  ;;  %s1057_s24 = scalar_lea.hbm %s1858_s9, %s1191_s25 }
 0x25d   : > { %v628_v32 = vpop.permute.xlu0 %627 }
 0x25e   : > { %v633_v33 = vsel %vm564_vm7, %v628_v32, 0 }
 0x25f   : > { %1233 = vmatpush3.bf16.xpose.msra.mxu0 %v633_v33 }
 0x260   : > { %1244 = vmatprep.subr.bf16.mxu0 %v1530_v0 }
 0x261   : > { %v625_v34 = vpop.permute.xlu0 %624 }
 0x265   : > { %v689_v35 = vpop.permute.xlu0 %688 }
 0x266   : > { %v694_v36 = vsel %vm517_vm5, %v689_v35, 0  ;;  %1235 = vmatmul.mubr.msk.bf16.vlgmr.msra.gmra.mxu0 %vm564_vm7, %v625_v34 }
 0x267   : > { %1239 = vmatpush3.bf16.msra.mxu1 %v694_v36  ;;  %1245 = vmatpush3.bf16.msra.mxu0 %v740_v37 }
 0x268   : > { %1250 = vmatprep.subr.bf16.mxu1 %v1530_v0  ;;  %1246 = vmatprep.mubr.msk.bf16.mxu0 %vm1531_vm0, %v1530_v0 }
 0x269   : > { %1256 = vmatprep.subr.bf16.mxu0 %v1530_v0  ;;  %v783_v58 = vpop.permute.xlu0 %782 }
 0x26d   : > { %v896_v60 = vpop.permute.xlu0 %895 }
 0x26e   : > { %v901_v61 = vsel %vm564_vm7, %v896_v60, 0 }
 0x271   : > { %v894_v62 = vpop.permute.xlu0 %893 }
 0x2b3   : > { %v605_v38 = vpop.f32.mrf.mxu1 }
 0x2b4   : > { %v611_v39 = vsel %vm564_vm7, %v605_v38, -inf }
 0x2b5   : > { %612 = vmax.xlane.f32.xlu0 %v611_v39  ;;  %v1230_v40 = vpop.f32.mrf.mxu1 }
 0x2b7   : > { %v608_v41 = vpop.f32.mrf.mxu1 }
 0x2b9   : > { %v1231_v42 = vpop.f32.mrf.mxu1 }
 0x326   : > { %v669_v43 = vpop.f32.mrf.mxu0 }
 0x327   : > { %v675_v44 = vsel %vm564_vm7, %v669_v43, -inf }
 0x328   : > { %676 = vmax.xlane.f32.xlu1 %v675_v44  ;;  %v1236_v45 = vpop.f32.mrf.mxu0 }
 0x32a   : > { %v672_v46 = vpop.f32.mrf.mxu0 }
 0x32c   : > { %v1237_v47 = vpop.f32.mrf.mxu0 }
 0x33e   : > { %v613_v63 = vpop.xlane.xlu0 %612 }
 0x33f   : > { %v614_v1 = vsub.f32 %v605_v38, %v613_v63 }
 0x341   : > { %v615_v3 = vmul.f32 1.442695, %v614_v1 }
 0x3b1   : > { %v677_v48 = vpop.xlane.xlu1 %676 }
 0x3b2   : > { %v678_v49 = vsub.f32 %v669_v43, %v677_v48 }
 0x3b4   : > { %v679_v50 = vmul.f32 1.442695, %v678_v49 }
 0x3b6   : > { %1357 = vpow2.f32 %v679_v50 }
 0x3c3   : > { %v1358_v51 = vpop.eup %1357 }
 0x3c4   : > { %v681_v52 = vsel %vm564_vm7, %v1358_v51, 0.0 }
 0x3c5   : > { %682 = vadd.xlane.f32.xlu1 %v681_v52 }
 0x3d6   : > { %784 = vrot.lane.b32.xlu1 %v563_v26, %s1536_s21 }
 0x44e   : > { %v683_v53 = vpop.xlane.xlu1 %682 }
 0x44f   : > { %1359 = vrcp.f32 %v683_v53 }
 0x450   : > { %1361 = vpow2.f32 %v615_v3 }
 0x452   : > { %v785_v56 = vpop.permute.xlu1 %784 }
 0x453   : > { %v790_v59 = vsel %vm564_vm7, %v785_v56, 0 }
 0x45c   : > { %v1360_v54 = vpop.eup %1359 }
 0x45d   : > { %v685_v55 = vmul.f32 %v1360_v54, %v1358_v51  ;;  %v1362_v14 = vpop.eup %1361 }
 0x45e   : > { %v617_v17 = vsel %vm564_vm7, %v1362_v14, 0.0 }
 0x45f   : > { %v686_v57 = vpack.c.bf16 %v685_v55, %v685_v55 }
 0x461   : > { %1241 = vmatmul.mubr.msk.bf16.vlgmr.msra.gmra.mxu1 %vm564_vm7, %v686_v57 }
 0x462   : > { %1251 = vmatpush3.bf16.xpose.msra.mxu1 %v790_v59  ;;  %1252 = vmatprep.mubr.msk.bf16.mxu1 %vm1531_vm0, %v1530_v0 }
 0x463   : > { %1262 = vmatprep.subr.bf16.mxu1 %v1530_v0 }
 0x469   : > { %1253 = vmatmul.mubr.msk.bf16.vlgmr.msra.gmra.mxu1 %vm564_vm7, %v783_v58 }
 0x46a   : > { %1263 = vmatpush3.bf16.xpose.msra.mxu1 %v901_v61  ;;  %1264 = vmatprep.mubr.msk.bf16.mxu1 %vm1531_vm0, %v1530_v0 }
 0x471   : > { %1265 = vmatmul.mubr.msk.bf16.vlgmr.msra.gmra.mxu1 %vm564_vm7, %v894_v62 }
 0x521   : > { %v1781_v2 = vpop.f32.mrf.mxu1 }
 0x523   : > { %v1242_v4 = vpop.f32.mrf.mxu1 }
 0x525   : > { %v733_v5 = vpop.f32.mrf.mxu1 }
 0x527   : > { %v1243_v6 = vpop.f32.mrf.mxu1 }
 0x529   : > { %v826_v7 = vpop.f32.mrf.mxu1 }
 0x52a   : > { %v832_v8 = vsel %vm564_vm7, %v826_v7, -inf }
 0x52b   : > { %833 = vmax.xlane.f32.xlu1 %v832_v8  ;;  %v1254_v9 = vpop.f32.mrf.mxu1 }
 0x52d   : > { %v829_v10 = vpop.f32.mrf.mxu1 }
 0x52e   : > { %v1188_v10 = vld [vmem:[%s1856_s7] ss:$0 sm:$0xff] }
 0x52f   : > { %v1255_v11 = vpop.f32.mrf.mxu1 }
 0x531   : > { %v937_v12 = vpop.f32.mrf.mxu1 }
 0x532   : > { %v943_v13 = vsel %vm564_vm7, %v937_v12, -inf }
 0x533   : > { %944 = vmax.xlane.f32.xlu0 %v943_v13  ;;  %v1266_v15 = vpop.f32.mrf.mxu1 }
 0x535   : > { %v940_v16 = vpop.f32.mrf.mxu1 }
 0x537   : > { %618 = vadd.xlane.f32.xlu0 %v617_v17  ;;  %v1267_v18 = vpop.f32.mrf.mxu1 }
 0x5b4   : > { %v834_v19 = vpop.xlane.xlu1 %833 }
 0x5b5   : > { %v835_v20 = vsub.f32 %v826_v7, %v834_v19 }
 0x5b7   : > { %v836_v21 = vmul.f32 1.442695, %v835_v20 }
 0x5b9   : > { %1363 = vpow2.f32 %v836_v21 }
 0x5bc   : > { %v945_v22 = vpop.xlane.xlu0 %944 }
 0x5bd   : > { %v946_v23 = vsub.f32 %v937_v12, %v945_v22  ;;  %v1189_v12 = vld [vmem:[%s1857_s8] ss:$0 sm:$0xff] }
 0x5bf   : > { %v947_v24 = vmul.f32 1.442695, %v946_v23 }
 0x5c0   : > { %v619_v25 = vpop.xlane.xlu0 %618 }
 0x5c1   : > { %1365 = vpow2.f32 %v947_v24 }
 0x5c2   : > { %1367 = vrcp.f32 %v619_v25 }
 0x5c6   : > { %v1364_v26 = vpop.eup %1363 }
 0x5c7   : > { %v838_v27 = vsel %vm564_vm7, %v1364_v26, 0.0 }
 0x5c8   : > { %839 = vadd.xlane.f32.xlu1 %v838_v27 }
 0x5ce   : > { %v1366_v28 = vpop.eup %1365 }
 0x5cf   : > { %v1368_v29 = vpop.eup %1367  ;;  %v949_v30 = vsel %vm564_vm7, %v1366_v28, 0.0 }
 0x5d0   : > { %950 = vadd.xlane.f32.xlu0 %v949_v30  ;;  %v621_v32 = vmul.f32 %v1368_v29, %v1362_v14 }
 0x5d2   : > { %v622_v33 = vpack.c.bf16 %v621_v32, %v621_v32 }
 0x5d4   : > { %1247 = vmatmul.mubr.msk.bf16.vlgmr.msra.gmra.mxu0 %vm564_vm7, %v622_v33 }
 0x5d5   : > { %1258 = vmatprep.mubr.msk.bf16.mxu0 %vm1531_vm0, %v1530_v0 }
 0x5d9   : > { %844 = vrot.lane.b32.xlu1 %v1750_v31, %s1538_s11  ;;  %s1046_s11 = scalar_lea.sflag [#allocation4], %s1709_s2 }
 0x5e6   : > { %955 = vrot.lane.b32.xlu0 %v1750_v31, %s1539_s15  ;;  %s1455_s15 = scalar_lea.vmem %s1060_s22, 128 }
 0x5e7   : > { %p1456_p0 = scmp.ne.s32.totalorder %s1060_s22, %s1455_s15  ;;  %p1463_p9 = scmp.lt.s32.totalorder %s1461_s13, %s1455_s15 }
 0x5e9   : > { %p1457_p2 = pnand %p1456_p0, %p1881_p1  ;;  %p1464_p12 = por %p1463_p9, %p1462_p6 }
 0x5eb   : > { %p1458_p4 = pneg %p1457_p2 }
 0x5ed   : > { %p1465_p3 = pnand %p1464_p12, %p1458_p4 }
 0x651   : > { %v840_v34 = vpop.xlane.xlu1 %839 }
 0x652   : > { %1369 = vrcp.f32 %v840_v34 }
 0x655   : > { %v845_v35 = vpop.permute.xlu1 %844 }
 0x656   : > { %v850_v36 = vsel %vm517_vm5, %v845_v35, 0 }
 0x657   : > { %1257 = vmatpush3.bf16.msra.mxu0 %v850_v36 }
 0x658   : > { %1268 = vmatprep.subr.bf16.mxu0 %v1530_v0 }
 0x659   : > { %v951_v37 = vpop.xlane.xlu0 %950 }
 0x65a   : > { %1371 = vrcp.f32 %v951_v37 }
 0x65d   : > { %v956_v40 = vpop.permute.xlu0 %955 }
 0x65e   : > { %v961_v42 = vsel %vm517_vm5, %v956_v40, 0 }
 0x65f   : > { %v1370_v38 = vpop.eup %1369 }
 0x660   : > { %v842_v39 = vmul.f32 %v1370_v38, %v1364_v26 }
 0x662   : > { %v843_v41 = vpack.c.bf16 %v842_v39, %v842_v39 }
 0x664   : > { %1259 = vmatmul.mubr.msk.bf16.vlgmr.msra.gmra.mxu0 %vm564_vm7, %v843_v41 }
 0x665   : > { %1269 = vmatpush3.bf16.msra.mxu0 %v961_v42  ;;  %1270 = vmatprep.mubr.msk.bf16.mxu0 %vm1531_vm0, %v1530_v0  ;;  %v1187_v0 = vld [vmem:[%s1855_s6] ss:$0 sm:$0xff] }
 0x667   : > { %v1372_v31 = vpop.eup %1371 }
 0x668   : > { %v953_v43 = vmul.f32 %v1372_v31, %v1366_v28 }
 0x66a   : > { %v954_v44 = vpack.c.bf16 %v953_v43, %v953_v43 }
 0x66c   : > { %1271 = vmatmul.mubr.msk.bf16.vlgmr.msra.gmra.mxu0 %vm564_vm7, %v954_v44 }
 0x694   : > { %v776_v45 = vpop.f32.mrf.mxu0 }
 0x695   : > { %v777_v52 = vadd.f32 %v776_v45, %v1781_v2 }
 0x696   : > { %v1248_v46 = vpop.f32.mrf.mxu0 }
 0x698   : > { %v779_v47 = vpop.f32.mrf.mxu0 }
 0x69a   : > { %v1249_v48 = vpop.f32.mrf.mxu0 }
 0x724   : > { %v886_v49 = vpop.f32.mrf.mxu0 }
 0x725   : > { %v892_v54 = vadd.f32 %v886_v49, %v777_v52 }
 0x726   : > { %v1260_v50 = vpop.f32.mrf.mxu0 }
 0x728   : > { %v889_v51 = vpop.f32.mrf.mxu0 }
 0x72a   : > { %v1261_v53 = vpop.f32.mrf.mxu0 }
 0x72c   : > { %v997_v55 = vpop.f32.mrf.mxu0 }
 0x72d   : > { %v1003_v56 = vadd.f32 %v997_v55, %v892_v54 }
 0x72e   : > { %v1272_v57 = vpop.f32.mrf.mxu0 }
 0x72f   : > { %v1011_v58 = vadd.f32 %v1187_v0, %v1003_v56 }
 0x730   : > { %v1000_v59 = vpop.f32.mrf.mxu0 }
 0x731   : > { %v1013_v60 = vsel %vm1012_vm8, %v1011_v58, 0.0  ;;  %v1016_v61 = vmul.f32 %v1011_v58, %v1011_v58 }
 0x732   : > { %1014 = vadd.xlane.f32.xlu1 %v1013_v60  ;;  %v1273_v62 = vpop.f32.mrf.mxu0 }
 0x733   : > { %v1017_v63 = vsel %vm1012_vm8, %v1016_v61, 0.0 }
 0x734   : > { %1018 = vadd.xlane.f32.xlu0 %v1017_v63 }
 0x7bb   : > { %v1015_v1 = vpop.xlane.xlu1 %1014 }
 0x7bc   : > { %v1020_v2 = vmul.f32 0.03125, %v1015_v1 }
 0x7bd   : > { %v1019_v3 = vpop.xlane.xlu0 %1018 }
 0x7be   : > { %v1022_v4 = vmul.f32 %v1020_v2, %v1020_v2  ;;  %v1021_v5 = vmul.f32 0.03125, %v1019_v3  ;;  %v1024_v8 = vsub.f32 %v1011_v58, %v1020_v2 }
 0x7c0   : > { %v1023_v6 = vsub.f32 %v1021_v5, %v1022_v4 }
 0x7c2   : > { %v1025_v7 = vadd.f32 1e-05, %v1023_v6 }
 0x7c4   : > { %1373 = vrsqrt.f32 %v1025_v7 }
 0x7d1   : > { %v1374_v9 = vpop.eup %1373 }
 0x7d2   : > { %v1027_v11 = vmul.f32 %v1374_v9, %v1024_v8 }
 0x7d4   : > { %v1035_v13 = vmul.f32 %v1188_v10, %v1027_v11 }
 0x7d6   : > { %v1043_v14 = vadd.f32 %v1189_v12, %v1035_v13 }
 0x7d8   : > { %1044 = vst.msk [vmem:[%s387_s29] sm:$0xff] %vm1012_vm8, %v1043_v14 }
 0x7d9   : > { %1468 = shalt.err (!%p1465_p3)
}
 0x7da   : > { %s1469_s14 = scalar_lea.hbm %s1057_s24, 128  ;;  %s1473_s19 = scalar_lea.hbm %s1858_s9, 256 }
 0x7db   : > { %p1470_p7 = scmp.ne.s32.totalorder %s1057_s24, %s1469_s14  ;;  %p1474_p8 = scmp.lt.s32.totalorder %s1057_s24, %s1858_s9 }
 0x7dc   : > { %p1475_p11 = scmp.lt.s32.totalorder %s1473_s19, %s1469_s14 }
 0x7dd   : > { %p1471_p10 = pnand %p1470_p7, %p1881_p1 }
 0x7de   : > { %p1476_p13 = por %p1475_p11, %p1474_p8 }
 0x7df   : > { %p1472_p5 = pneg %p1471_p10 }
 0x7e1   : > { %p1477_p0 = pnand %p1476_p13, %p1472_p5 }
 0x7e3   : > { %1480 = shalt.err (!%p1477_p0)
}
 0x7e4   : > { %1284 = dma.vmem_to_hbm [thread:$0]  (%p1881_p1), %s1060_s22, 128, %s1057_s24, %s1046_s11  }
 0x7e5 PF: > { %s1071_s25 = sand.u32 1, %s1511_s30   ;;  %p1882_p2 = scmp.ne.s32.totalorder %s1868_s16, 0 }
 0x7e6   : > { %p1883_p4 = scmp.ge.s32.totalorder %s1523_s12, 2  ;;  %s1072_s29 = scalar_lea.sflag [#allocation4], %s1071_s25 }
 0x7e8   : > { %p1298_p6 = pnand %p1883_p4, %p1882_p2 }
 0x7ea   : > { %p1299_p9 = pneg %p1298_p6 }
 0x7ec   : > { %1506 = dma.done.wait (%p1299_p9), %s1072_s29, 128  }
 0x7ed   : > { %1508 = vsyncadd (%p1299_p9), %s1072_s29, 4294967168  ;;  %s1884_s4 = sld [smem:[#allocation12_spill]]  ;;  %p23_p12 = scmp.ge.s32.totalorder %s1663_s18, 4  }
 0x7ee   : > { %s1885_s11 = sld [smem:[#allocation13_spill]]  ;;  %s1886_s30 = smov %s1515_s10 }
 0x7ef   : > { %s1888_s12 = smov %s1663_s18  ;;  %25 = sbr.rel (!%p23_p12) target bundleno = 9 (0x9), region = 112 }
 0x7f3   : > { %s1887_s10 = smov %s1884_s4 }
 0x7f4   :  { %1077 = vsyncpa [#allocation3], 1 }
 0x7f5   :  { %1079 = vsyncpa [#allocation3 + $0x1], 1 }
 0x7f6   :  { %1080 = vsyncpa [#allocation6], 1 }
 0x7f7   :  { %1081 = vsyncpa [#allocation4], 1 }
 0x7f8   :  { %1083 = vsyncpa [#allocation4 + $0x1], 1 }

</bundles_post_ra>
